<compile_context>
chip_gen: v7x
topology: tpu7x:2x2x1
jax: 0.10.0
libtpu: 0.0.40
codegen_flags: <defaults>
</compile_context>

<pallas_src>
import math

import jax
import jax.numpy as jnp
from jax.experimental import pallas as pl
from jax.experimental.pallas import tpu as pltpu


# ---- DAC constants (match module __init__ defaults) -------------------------
NBITS = 8
VDD = 3.3
VSS = 0.0
FULL_LVLS = 2 ** NBITS - 1                  # 255
HALF_LVLS = (FULL_LVLS - 1) / 2.0           # 127.0
DELTA_V = (VDD - VSS) / (FULL_LVLS - 1)     # 3.3 / 254

_LANES = 128
_SUBLANES = 8

_FUSED_2D_LIMIT = 4 << 20     # bytes: single-block (rows,128) fused fast path
_FUSED_1D_LIMIT = 256 << 10   # bytes: single-block flat fused path (ragged n)
_VMEM_LIMIT = 32 << 20        # safe on v5e/v6e (128 MiB) and v7x (64 MiB)


def _round_up(v, m):
    return -(-v // m) * m


def _cdiv(a, b):
    return -(-a // b)


def _is_v7():
    try:
        kind = jax.devices()[0].device_kind.lower()
    except Exception:
        return False
    return ("v7" in kind) or ("7x" in kind)


def _quantize(x_f32, thr):
    # round(x * (half_lvls / thr)) == round(x / (thr / half_lvls)) up to 1 ulp
    # of the scale, i.e. the same quantizer as the PyTorch reference.
    # jnp.maximum guards the all-zero-input corner (PyTorch would produce NaN).
    inv_delta = jnp.float32(HALF_LVLS) / jnp.maximum(thr, jnp.float32(1e-30))
    clipped = jnp.clip(x_f32, -thr, thr)            # F.hardtanh(x, -thr, thr)
    return jnp.round(clipped * inv_delta) * jnp.float32(DELTA_V)


# ---- Fused fast path: whole tensor resident in VMEM -------------------------
def _dac_fused_kernel(x_ref, o_ref):
    x = x_ref[...].astype(jnp.float32)              # native-dtype load, f32 math
    thr = jnp.max(jnp.abs(x))
    o_ref[...] = _quantize(x, thr).astype(o_ref.dtype)


# ---- Pass 1 (large path): per-block partial abs-max, parallel-friendly ------
def _make_absmax_kernel(tile_rows, total_rows):
    # Partial last block: OOB rows are unspecified garbage and must be masked
    # so they cannot inflate the threshold.
    needs_mask = (total_rows % tile_rows) != 0

    def kernel(x_ref, pmax_ref):
        a = jnp.abs(x_ref[...].astype(jnp.float32))
        if needs_mask:
            i = pl.program_id(0)
            valid = total_rows - i * tile_rows      # >= tile_rows except last
            rid = jax.lax.broadcasted_iota(jnp.int32, (tile_rows, _LANES), 0)
            a = jnp.where(rid < valid, a, jnp.float32(0.0))
        # Fold sublane groups with plain VPU maxes (no XLU, no serial scalar
        # accumulator) so the grid axis can stay 'parallel'.
        part = jnp.max(a.reshape(tile_rows // _SUBLANES, _SUBLANES, _LANES),
                       axis=0)
        pmax_ref[...] = part[None]

    return kernel


# ---- Pass 2 (large path): clip -> quantize -> voltage -----------------------
def _dac_tile_kernel(thr_ref, x_ref, o_ref):
    thr = thr_ref[0, 0]
    x = x_ref[...].astype(jnp.float32)
    o_ref[...] = _quantize(x, thr).astype(o_ref.dtype)


def dac_forward(x, *, target_block_bytes=None):
    """Pallas implementation of DAC.forward (quan_method='dynamic')."""
    orig_shape = x.shape
    dtype = x.dtype
    n = int(math.prod(orig_shape)) if orig_shape else 1
    if n == 0:
        return x

    dsize = jnp.dtype(dtype).itemsize
    pack = max(1, 4 // max(dsize, 1))               # sublane packing factor
    row_granule = _SUBLANES * pack                  # 8 f32 / 16 bf16 / 32 int8

    xf = x.reshape(-1)                              # free (bitcast) reshape
    lane_aligned = (n % _LANES == 0)
    rows_exact = n // _LANES

    fused_params = pltpu.CompilerParams(vmem_limit_bytes=_VMEM_LIMIT)

    # ---- fused single-call fast paths --------------------------------------
    if lane_aligned:
        padded_2d = _round_up(max(rows_exact, 1), row_granule) * _LANES * dsize
        if padded_2d <= _FUSED_2D_LIMIT:
            x2d = xf.reshape(rows_exact, _LANES)
            out2d = pl.pallas_call(
                _dac_fused_kernel,
                out_shape=jax.ShapeDtypeStruct((rows_exact, _LANES), dtype),
                in_specs=[pl.BlockSpec(memory_space=pltpu.MemorySpace.VMEM)],
                out_specs=pl.BlockSpec(memory_space=pltpu.MemorySpace.VMEM),
                compiler_params=fused_params,
            )(x2d)
            return out2d.reshape(orig_shape)
    elif n * dsize <= _FUSED_1D_LIMIT:
        # Ragged small tensor: single 1-D block, no pad / slice at all.
        out_flat = pl.pallas_call(
            _dac_fused_kernel,
            out_shape=jax.ShapeDtypeStruct((n,), dtype),
            in_specs=[pl.BlockSpec(memory_space=pltpu.MemorySpace.VMEM)],
            out_specs=pl.BlockSpec(memory_space=pltpu.MemorySpace.VMEM),
            compiler_params=fused_params,
        )(xf)
        return out_flat.reshape(orig_shape)

    # ---- two-pass tiled path (large tensors) --------------------------------
    is_v7 = _is_v7()
    if target_block_bytes is None:
        target_block_bytes = (2 << 20) if is_v7 else (1 << 20)

    if lane_aligned:
        rows = rows_exact
        x_flat = xf
    else:
        # TODO(synk): lane-granule pad + final slice are extra HBM passes for
        # large non-128-aligned element counts; a manual-DMA ragged tail would
        # remove them.
        n_pad = _round_up(n, _LANES)
        x_flat = jnp.pad(xf, (0, n_pad - n))
        rows = n_pad // _LANES

    x2d = x_flat.reshape(rows, _LANES)

    tr = max(row_granule,
             (target_block_bytes // (_LANES * dsize)) // row_granule * row_granule)
    if rows >= row_granule:
        tr = min(tr, (rows // row_granule) * row_granule)
    else:                                           # unreachable given gating
        tr = rows
    grid = _cdiv(rows, tr)

    # v7x has two TensorCores: make sure the 'parallel' axis has >= 2 blocks.
    if is_v7 and grid == 1 and rows > row_granule:
        tr = max(row_granule, _round_up(_cdiv(rows, 2), row_granule))
        tr = min(tr, (rows // row_granule) * row_granule)
        grid = _cdiv(rows, tr)

    assert tr % _SUBLANES == 0

    cp = pltpu.CompilerParams(dimension_semantics=("parallel",),
                              vmem_limit_bytes=_VMEM_LIMIT)

    # --- pass 1: per-block partial abs-max, then a tiny global reduce --------
    partials = pl.pallas_call(
        _make_absmax_kernel(tr, rows),
        out_shape=jax.ShapeDtypeStruct((grid, _SUBLANES, _LANES), jnp.float32),
        grid_spec=pltpu.PrefetchScalarGridSpec(
            num_scalar_prefetch=0,
            grid=(grid,),
            in_specs=[pl.BlockSpec((tr, _LANES), lambda i: (i, 0))],
            out_specs=pl.BlockSpec((1, _SUBLANES, _LANES), lambda i: (i, 0, 0)),
        ),
        compiler_params=cp,
    )(x2d)
    thr = jnp.max(partials).reshape(1, 1)           # tiny; XLA reduces it

    # --- pass 2: elementwise clip / quantize / voltage -----------------------
    out2d = pl.pallas_call(
        _dac_tile_kernel,
        out_shape=jax.ShapeDtypeStruct((rows, _LANES), dtype),
        grid_spec=pltpu.PrefetchScalarGridSpec(
            num_scalar_prefetch=0,
            grid=(grid,),
            in_specs=[
                pl.BlockSpec(memory_space=pltpu.SMEM),              # threshold
                pl.BlockSpec((tr, _LANES), lambda i: (i, 0)),       # x tile
            ],
            out_specs=pl.BlockSpec((tr, _LANES), lambda i: (i, 0)),
        ),
        compiler_params=cp,
    )(thr, x2d)

    if lane_aligned:
        return out2d.reshape(orig_shape)            # no-copy on aligned path
    return out2d.reshape(-1)[:n].reshape(orig_shape)


def _dac_reference(x):
    """Pure-JAX reference mirroring the PyTorch forward pass (same
    multiply-by-inverse-scale formulation as the kernels)."""
    xf = x.astype(jnp.float32)
    thr = jnp.max(jnp.abs(xf))
    clipped = jnp.clip(xf, -thr, thr)
    inv_delta = HALF_LVLS / thr
    quant = jnp.round(clipped * inv_delta)
    return (quant * DELTA_V).astype(x.dtype)


if __name__ == "__main__":
    key = jax.random.PRNGKey(0)
    k0, k1, k2, k3 = jax.random.split(key, 4)

    # 1) Small NCHW activation tensor (lane-aligned fused fast path).
    x = jax.random.normal(k0, (2, 4, 16, 16), dtype=jnp.float32) * 2.5
    out = jax.block_until_ready(dac_forward(x))
    ref = _dac_reference(x)
    assert out.shape == x.shape and out.dtype == x.dtype
    assert jnp.allclose(out, ref, atol=1e-5, rtol=1e-5), (
        float(jnp.max(jnp.abs(out - ref))))

    # 2) Ragged small tensor (1-D fused path, no pad / slice).
    x2 = jax.random.normal(k1, (3, 5, 7, 11), dtype=jnp.float32) * 1.7
    out2 = jax.block_until_ready(dac_forward(x2))
    ref2 = _dac_reference(x2)
    assert out2.shape == x2.shape and out2.dtype == x2.dtype
    assert jnp.allclose(out2, ref2, atol=1e-5, rtol=1e-5), (
        float(jnp.max(jnp.abs(out2 - ref2))))

    # 3) Larger aligned tensor: exercises the two-pass tiled path.
    x3 = jax.random.normal(k2, (2, 64, 128, 128), dtype=jnp.float32) * 3.1
    out3 = jax.block_until_ready(dac_forward(x3))
    ref3 = _dac_reference(x3)
    assert out3.shape == x3.shape and out3.dtype == x3.dtype
    assert jnp.allclose(out3, ref3, atol=1e-5, rtol=1e-5), (
        float(jnp.max(jnp.abs(out3 - ref3))))

    # 4) Larger ragged tensor: two-pass path with a masked partial last block.
    x4 = jax.random.normal(k3, (3, 7, 101, 101), dtype=jnp.float32) * 0.9
    out4 = jax.block_until_ready(dac_forward(x4))
    ref4 = _dac_reference(x4)
    assert out4.shape == x4.shape and out4.dtype == x4.dtype
    assert jnp.allclose(out4, ref4, atol=1e-5, rtol=1e-5), (
        float(jnp.max(jnp.abs(out4 - ref4))))

    print("KERNEL_OK")
</pallas_src>

<mosaic_0001>
module attributes {stable_mosaic.version = 11 : i64} {
  func.func @_dac_fused_kernel(%arg0: memref<16x128xf32, #tpu.memory_space<vmem>>, %arg1: memref<16x128xf32, #tpu.memory_space<vmem>>) attributes {dimension_semantics = [], scalar_prefetch = 0 : i64, scratch_operands = 0 : i64, tpu.core_type = #tpu.core_type<tc>} {
    %c0 = arith.constant 0 : index
    %c0_0 = arith.constant 0 : index
    %0 = vector.load %arg0[%c0, %c0_0] : memref<16x128xf32, #tpu.memory_space<vmem>>, vector<16x128xf32>
    %1 = math.absf %0 : vector<16x128xf32>
    %2 = vector.shape_cast %1 : vector<16x128xf32> to vector<1x16x128xf32>
    %cst = arith.constant dense<0xFF800000> : vector<1xf32>
    %3 = vector.multi_reduction <maximumf>, %2, %cst [1, 2] : vector<1x16x128xf32> to vector<1xf32>
    %4 = vector.shape_cast %3 : vector<1xf32> to vector<1x1x1xf32>
    %5 = vector.extract %4[0, 0, 0] : f32 from vector<1x1x1xf32>
    %cst_1 = arith.constant 1.000000e-30 : f32
    %6 = arith.maximumf %5, %cst_1 : f32
    %cst_2 = arith.constant 1.270000e+02 : f32
    %7 = arith.divf %cst_2, %6 : f32
    %cst_3 = arith.constant 0.000000e+00 : f32
    %8 = arith.subf %cst_3, %5 : f32
    %9 = vector.broadcast %8 : f32 to vector<16x128xf32>
    %10 = arith.maximumf %9, %0 : vector<16x128xf32>
    %11 = vector.broadcast %5 : f32 to vector<16x128xf32>
    %12 = arith.minimumf %11, %10 : vector<16x128xf32>
    %13 = vector.broadcast %7 : f32 to vector<16x128xf32>
    %14 = arith.mulf %12, %13 : vector<16x128xf32>
    %15 = math.roundeven %14 : vector<16x128xf32>
    %cst_4 = arith.constant 0.0129921259 : f32
    %16 = vector.broadcast %cst_4 : f32 to vector<16x128xf32>
    %17 = arith.mulf %15, %16 : vector<16x128xf32>
    %c0_5 = arith.constant 0 : index
    %c0_6 = arith.constant 0 : index
    %18 = vector.load %arg1[%c0_5, %c0_6] : memref<16x128xf32, #tpu.memory_space<vmem>>, vector<16x128xf32>
    tpu.vector_store %arg1[%c0_5, %c0_6], %17 {strides = array<i32>} : memref<16x128xf32, #tpu.memory_space<vmem>>, vector<16x128xf32>,
    return
  }
}

</mosaic_0001>

<bundles_post_ra>
// kernel: tpu_custom_call.1
= control target key start
LH: loop header
LB: loop body
LE: loop exit
PB: predicated region body
PF: predicated region fallthrough
CT: control target
= control target key end

     0   :  { %6 = vsyncpa [#allocation3], 0  ;;  %s181_s0 = inlined_call_operand.hbm [shape: f32[16,128], index: 0, kind: input, shape index: {}]   ;;  %s182_s1 = inlined_call_operand.hbm [shape: f32[16,128], index: 1, kind: output, shape index: {}]  }
   0x1   :  { %7 = vsyncpa [#allocation4], 0  ;;  %s136_s6 = smov [#allocation2]   ;;  %s88_s10 = scalar_lea.hbm %s181_s0, 256 }
   0x2   :  { %s13_s7 = sshll.u32 %s136_s6, 4  ;;  %p89_p0 = scmp.ne.s32.totalorder %s181_s0, %s88_s10  ;;  %s14_s7 = int_to_ptr.vmem [resolvable:$true] %s13_s7 }
   0x3   :  { %p92_p1 = scmp.lt.u32.totalorder %s88_s10, %s181_s0 }
   0x5   :  { %p94_p2 = pnand %p92_p1, %p89_p0 }
   0x7   :  { %97 = shalt.err (!%p94_p2)
}
   0x8   :  { %s98_s15 = scalar_lea.vmem %s14_s7, 256  ;;  %p103_p4 = scmp.lt.s32.totalorder %s14_s7, %s14_s7 }
   0x9   :  { %p99_p3 = scmp.ne.s32.totalorder %s14_s7, %s98_s15  ;;  %p104_p5 = scmp.lt.s32.totalorder %s98_s15, %s98_s15 }
   0xb   :  { %p105_p6 = por %p104_p5, %p103_p4 }
   0xd   :  { %p106_p7 = pnand %p105_p6, %p99_p3 }
   0xf   :  { %109 = shalt.err (!%p106_p7)
}
  0x10   :  { %s137_s16 = smov 128   ;;  %s138_s17 = smov 8  }
  0x11   :  { %19 = dma.hbm_to_vmem [thread:$0]  %s181_s0, 256, %s14_s7, [#allocation3], %s137_s16, %s137_s16, %s138_s17  }
  0x12   :  { %132 = dma.done.wait [#allocation3], 256  }
  0x13   :  { %133 = vsyncadd [#allocation3], 4294967040  ;;  %v23_v0 = vld [vmem:[#allocation2] sm:$0xff]  ;;  %v24_v1 = vld [vmem:[#allocation2 + $0x8] sm:$0xff]  ;;  %s139_s21 = smov 1e-30  }
  0x14   :  { %v25_v2 = vand.u32 2147483647, %v23_v0  ;;  %v26_v3 = vand.u32 2147483647, %v24_v1  ;;  %s140_s25 = smov [#allocation5]  }
  0x15   :  { %s63_s26 = sshll.u32 %s140_s25, 4  ;;  %s64_s26 = int_to_ptr.vmem [resolvable:$true] %s63_s26 }
  0x16   :  { %v27_v4 = vmax.f32.f32 %v25_v2, %v26_v3  ;;  %s110_s27 = scalar_lea.vmem %s64_s26, 256  ;;  %p115_p9 = scmp.lt.s32.totalorder %s64_s26, %s64_s26 }
  0x17   :  { %p111_p8 = scmp.ne.s32.totalorder %s64_s26, %s110_s27  ;;  %p116_p10 = scmp.lt.s32.totalorder %s110_s27, %s110_s27 }
  0x18   :  { %28 = vmax.xlane.f32.xlu0 %v27_v4 }
  0x19   :  { %p117_p11 = por %p116_p10, %p115_p9 }
  0x1b   :  { %p118_p12 = pnand %p117_p11, %p111_p8 }
  0xa5   :  { %v29_v5 = vpop.xlane.xlu0 %28 }
  0xa6   :  { %v30_v6 = vrot.slane %v29_v5, 4 }
  0xa8   :  { %v31_v7 = vmax.f32 %v29_v5, %v30_v6 }
  0xaa   :  { %v32_v8 = vrot.slane %v31_v7, 2 }
  0xac   :  { %v33_v9 = vmax.f32 %v31_v7, %v32_v8 }
  0xae   :  { %v34_v10 = vrot.slane %v33_v9, 1 }
  0xb0   :  { %v35_v11 = vmax.f32 %v33_v9, %v34_v10 }
  0xb2   :  { %75 = vpush %v35_v11 }
  0xe3   :  { %s76_s20 = spop %75 }
  0xe4   :  { %s37_s22 = smax.f32 %s139_s21, %s76_s20  ;;  %s42_s0 = ssub.f32 0.0, %s76_s20  ;;  %v46_v17 = vstv %s76_s20 }
  0xe5   :  { %v38_v12 = vstv %s37_s22 }
  0xe6   :  { %86 = vrcp.f32 %v38_v12  ;;  %v43_v14 = vstv %s42_s0 }
  0xe7   :  { %v44_v15 = vmax.f32 %v43_v14, %v23_v0  ;;  %v45_v16 = vmax.f32 %v43_v14, %v24_v1 }
  0xe9   :  { %v47_v18 = vmin.f32 %v46_v17, %v44_v15  ;;  %v48_v19 = vmin.f32 %v46_v17, %v45_v16 }
  0xf0   :  { %v87_v13 = vpop.eup %86 }
  0xf1   :  { %77 = vpush %v87_v13 }
 0x122   :  { %s78_s23 = spop %77 }
 0x123   :  { %s41_s24 = smul.f32 127.0, %s78_s23 }
 0x125   :  { %v49_v20 = vstv %s41_s24 }
 0x126   :  { %v50_v21 = vmul.f32 %v49_v20, %v47_v18  ;;  %v51_v22 = vmul.f32 %v49_v20, %v48_v19 }
 0x128   :  { %v79_v23 = vround.rtne.f32 %v50_v21  ;;  %v80_v24 = vround.rtne.f32 %v51_v22 }
 0x12a   :  { %v54_v25 = vmul.f32 0.012992126, %v79_v23  ;;  %v55_v26 = vmul.f32 0.012992126, %v80_v24 }
 0x12c   :  { %56 = vst [vmem:[#allocation5] sm:$0xff] %v54_v25  ;;  %57 = vst [vmem:[#allocation5 + $0x8] sm:$0xff] %v55_v26 }
 0x12d   :  { %121 = shalt.err (!%p118_p12)
}
 0x12e   :  { %s122_s30 = scalar_lea.hbm %s182_s1, 256 }
 0x12f   :  { %p123_p13 = scmp.ne.s32.totalorder %s182_s1, %s122_s30  ;;  %p126_p0 = scmp.lt.u32.totalorder %s122_s30, %s182_s1 }
 0x131   :  { %p128_p1 = pnand %p126_p0, %p123_p13 }
 0x133   :  { %131 = shalt.err (!%p128_p1)
}
 0x134   :  { %69 = dma.vmem_to_hbm [thread:$0]  %s64_s26, 256, %s182_s1, [#allocation4], %s137_s16, %s137_s16, %s138_s17  }
 0x135   :  { %134 = dma.done.wait [#allocation4], 256  }
 0x136   :  { %135 = vsyncadd [#allocation4], 4294967040 }
 0x137   :  { %73 = vsyncpa [#allocation3], 1 }
 0x138   :  { %74 = vsyncpa [#allocation4], 1 }

</bundles_post_ra>
